<compile_context>
chip_gen: v7x
topology: tpu7x:2x2x1
jax: 0.10.0
libtpu: 0.0.40
codegen_flags: <defaults>
</compile_context>

<pallas_src>
import functools

import jax
import jax.numpy as jnp
from jax.experimental import pallas as pl
from jax.experimental.pallas import tpu as pltpu


def _round_up(n, m):
    return ((n + m - 1) // m) * m


def mlp_colorhead_kernel(x_ref, w1_ref, b1_ref, w2_ref, b2_ref, wc_ref, bc_ref,
                         o_ref, *, mm_dtype):
    # Layer 1: (TB, Kp) @ (Kp, 64N) -> f32 accumulate; bias + ReLU in f32 (VPU).
    h1 = jnp.dot(x_ref[...], w1_ref[...], preferred_element_type=jnp.float32)
    h1 = jnp.maximum(h1 + b1_ref[...], 0.0)
    # Layer 2: (TB, 64N) @ (64N, 32N).
    h2 = jnp.dot(h1.astype(mm_dtype), w2_ref[...], preferred_element_type=jnp.float32)
    h2 = jnp.maximum(h2 + b2_ref[...], 0.0)
    # Fused 3-head ColorHead: one (TB, 768) matmul, single lane-dense store.
    o = jnp.dot(h2.astype(mm_dtype), wc_ref[...], preferred_element_type=jnp.float32)
    o_ref[...] = (o + bc_ref[...]).astype(o_ref.dtype)


def mlp_n_64n_32n_3x256(x, params, *, block_b=1024, use_bf16=True):
    """x: (B, 3N) float32 -> (B, 256, 3) float32 (matches ColorHead torch.cat(dim=2))."""
    B, K = x.shape
    D1 = params["w1"].shape[1]      # 64N
    D2 = params["w2"].shape[1]      # 32N
    C = params["wc1"].shape[1]      # 256 per head
    CH = 3 * C                      # fused head width (768)

    # --- pad the first contraction dim to a lane-aligned width (multiple of 128) ---
    Kp = _round_up(max(K, 1), 128)
    w1 = params["w1"]
    if Kp != K:
        x = jnp.pad(x, ((0, 0), (0, Kp - K)))
        w1 = jnp.pad(w1, ((0, Kp - K), (0, 0)))

    # --- fuse the three heads; interleave channels so that out.reshape(B, C, 3)
    #     equals torch.cat([ch1(x).unsqueeze(2), ch2(x).unsqueeze(2),
    #                       ch3(x).unsqueeze(2)], dim=2) ---
    wc = jnp.stack([params["wc1"], params["wc2"], params["wc3"]], axis=2).reshape(D2, CH)
    bc = jnp.stack([params["bc1"], params["bc2"], params["bc3"]], axis=2).reshape(1, CH)

    mm_dtype = jnp.bfloat16 if use_bf16 else jnp.float32
    x_k = x.astype(mm_dtype)
    w1_k = w1.astype(mm_dtype)
    w2_k = params["w2"].astype(mm_dtype)
    wc_k = wc.astype(mm_dtype)
    b1 = params["b1"].astype(jnp.float32)
    b2 = params["b2"].astype(jnp.float32)
    bc = bc.astype(jnp.float32)

    # --- batch tiling: TB rows per grid step, weights resident across steps ---
    TB = min(block_b, _round_up(B, 8))
    Bp = _round_up(B, TB)
    if Bp != B:
        x_k = jnp.pad(x_k, ((0, Bp - B), (0, 0)))
    grid = (Bp // TB,)

    itemsize = jnp.dtype(mm_dtype).itemsize
    flops = 2 * Bp * (Kp * D1 + D1 * D2 + D2 * CH)
    bytes_accessed = (
        Bp * Kp * itemsize                              # x
        + (Kp * D1 + D1 * D2 + D2 * CH) * itemsize      # weights
        + (D1 + D2 + CH) * 4                            # biases (f32)
        + Bp * CH * 4                                   # output (f32)
    )

    kernel = functools.partial(mlp_colorhead_kernel, mm_dtype=mm_dtype)
    out = pl.pallas_call(
        kernel,
        grid=grid,
        out_shape=jax.ShapeDtypeStruct((Bp, CH), jnp.float32),
        in_specs=[
            pl.BlockSpec((TB, Kp), lambda i: (i, 0)),     # x: tiled over batch
            pl.BlockSpec((Kp, D1), lambda i: (0, 0)),     # weights/biases: VMEM-resident
            pl.BlockSpec((1, D1), lambda i: (0, 0)),
            pl.BlockSpec((D1, D2), lambda i: (0, 0)),
            pl.BlockSpec((1, D2), lambda i: (0, 0)),
            pl.BlockSpec((D2, CH), lambda i: (0, 0)),
            pl.BlockSpec((1, CH), lambda i: (0, 0)),
        ],
        out_specs=pl.BlockSpec((TB, CH), lambda i: (i, 0)),
        compiler_params=pltpu.CompilerParams(
            dimension_semantics=("parallel",),            # 2x on v7x's dual TC
        ),
        cost_estimate=pl.CostEstimate(
            flops=flops, transcendentals=0, bytes_accessed=bytes_accessed),
    )(x_k, w1_k, b1, w2_k, b2, wc_k, bc)

    # Free row-major reshape: (B, 768) -> (B, 256, 3) == torch ColorHead output layout.
    return out[:B].reshape(B, C, 3)


def init_params(key, N):
    """Deterministic init mimicking PyTorch Linear default (uniform +/- 1/sqrt(fan_in))."""
    def linear(k, fan_in, fan_out):
        kw, kb = jax.random.split(k)
        bound = 1.0 / (fan_in ** 0.5)
        w = jax.random.uniform(kw, (fan_in, fan_out), jnp.float32, -bound, bound)
        b = jax.random.uniform(kb, (1, fan_out), jnp.float32, -bound, bound)
        return w, b

    k1, k2, k3, k4, k5 = jax.random.split(key, 5)
    w1, b1 = linear(k1, 3 * N, 64 * N)
    w2, b2 = linear(k2, 64 * N, 32 * N)
    wc1, bc1 = linear(k3, 32 * N, 256)
    wc2, bc2 = linear(k4, 32 * N, 256)
    wc3, bc3 = linear(k5, 32 * N, 256)
    return dict(w1=w1, b1=b1, w2=w2, b2=b2,
                wc1=wc1, bc1=bc1, wc2=wc2, bc2=bc2, wc3=wc3, bc3=bc3)


def reference_forward(x, p):
    """Pure-JAX f32 reference of the same forward pass (for correctness check)."""
    h1 = jnp.maximum(x @ p["w1"] + p["b1"], 0.0)
    h2 = jnp.maximum(h1 @ p["w2"] + p["b2"], 0.0)
    o1 = h2 @ p["wc1"] + p["bc1"]
    o2 = h2 @ p["wc2"] + p["bc2"]
    o3 = h2 @ p["wc3"] + p["bc3"]
    return jnp.stack([o1, o2, o3], axis=2)


if __name__ == "__main__":
    N = 4          # widths = [12, 256, 128] + 3x256 heads
    key = jax.random.PRNGKey(0)
    k_params, k_x = jax.random.split(key)
    params = init_params(k_params, N)

    # Test 1: single-tile batch, f32 matmuls -> exact match vs. pure-JAX reference.
    B = 8
    x = jax.random.normal(k_x, (B, 3 * N), dtype=jnp.float32)
    ref = jax.block_until_ready(reference_forward(x, params))
    out_f32 = jax.block_until_ready(mlp_n_64n_32n_3x256(x, params, use_bf16=False))
    assert out_f32.shape == (B, 256, 3), out_f32.shape
    assert jnp.allclose(out_f32, ref, atol=1e-4, rtol=1e-4)

    # Test 2: default bf16-matmul path (full-rate MXU on v6e/v7x), looser tolerance.
    out_bf16 = jax.block_until_ready(mlp_n_64n_32n_3x256(x, params, use_bf16=True))
    assert out_bf16.shape == (B, 256, 3), out_bf16.shape
    assert jnp.allclose(out_bf16, ref, atol=5e-2, rtol=5e-2)

    # Test 3: batch not a multiple of the tile -> exercises grid > 1, weights kept
    # resident in VMEM across grid steps, and the pad/slice path.
    B2 = 20
    x2 = jax.random.normal(jax.random.PRNGKey(1), (B2, 3 * N), dtype=jnp.float32)
    ref2 = jax.block_until_ready(reference_forward(x2, params))
    out2 = jax.block_until_ready(
        mlp_n_64n_32n_3x256(x2, params, block_b=8, use_bf16=False))
    assert out2.shape == (B2, 256, 3), out2.shape
    assert jnp.allclose(out2, ref2, atol=1e-4, rtol=1e-4)

    print("KERNEL_OK")
</pallas_src>

<mosaic_0001>
module attributes {stable_mosaic.version = 11 : i64} {
  func.func @mlp_colorhead_kernel(%arg0: i32, %arg1: memref<8x128xf32, #tpu.memory_space<vmem>>, %arg2: memref<128x256xf32, #tpu.memory_space<vmem>>, %arg3: memref<1x256xf32, #tpu.memory_space<vmem>>, %arg4: memref<256x128xf32, #tpu.memory_space<vmem>>, %arg5: memref<1x128xf32, #tpu.memory_space<vmem>>, %arg6: memref<128x768xf32, #tpu.memory_space<vmem>>, %arg7: memref<1x768xf32, #tpu.memory_space<vmem>>, %arg8: memref<8x768xf32, #tpu.memory_space<vmem>>) attributes {dimension_semantics = [#tpu.dimension_semantics<parallel>], iteration_bounds = array<i64: 1>, scalar_prefetch = 0 : i64, scratch_operands = 0 : i64, tpu.core_type = #tpu.core_type<tc>, window_params = [{transform_indices = @transform_0, window_bounds = array<i64: 8, 128>}, {pipeline_mode = #tpu.pipeline_mode<synchronous>, transform_indices = @transform_1, window_bounds = array<i64: 128, 256>}, {pipeline_mode = #tpu.pipeline_mode<synchronous>, transform_indices = @transform_2, window_bounds = array<i64: 1, 256>}, {pipeline_mode = #tpu.pipeline_mode<synchronous>, transform_indices = @transform_3, window_bounds = array<i64: 256, 128>}, {pipeline_mode = #tpu.pipeline_mode<synchronous>, transform_indices = @transform_4, window_bounds = array<i64: 1, 128>}, {pipeline_mode = #tpu.pipeline_mode<synchronous>, transform_indices = @transform_5, window_bounds = array<i64: 128, 768>}, {pipeline_mode = #tpu.pipeline_mode<synchronous>, transform_indices = @transform_6, window_bounds = array<i64: 1, 768>}, {transform_indices = @transform_7, window_bounds = array<i64: 8, 768>}]} {
    %c0 = arith.constant 0 : index
    %c0_0 = arith.constant 0 : index
    %0 = vector.load %arg1[%c0, %c0_0] : memref<8x128xf32, #tpu.memory_space<vmem>>, vector<8x128xf32>
    %c0_1 = arith.constant 0 : index
    %c0_2 = arith.constant 0 : index
    %1 = vector.load %arg2[%c0_1, %c0_2] : memref<128x256xf32, #tpu.memory_space<vmem>>, vector<128x256xf32>
    %cst = arith.constant dense<0.000000e+00> : vector<8x256xf32>
    %2 = tpu.matmul %0, %1, %cst {dimension_numbers = #tpu.dot_dimension_numbers<[1], [0], [0], [1], [0, 0, 1, 1], [], []>} : vector<8x128xf32>, vector<128x256xf32>, vector<8x256xf32> -> vector<8x256xf32>
    %c0_3 = arith.constant 0 : index
    %c0_4 = arith.constant 0 : index
    %3 = vector.load %arg3[%c0_3, %c0_4] : memref<1x256xf32, #tpu.memory_space<vmem>>, vector<1x256xf32>
    %4 = vector.broadcast %3 : vector<1x256xf32> to vector<8x256xf32>
    %5 = arith.addf %2, %4 : vector<8x256xf32>
    %cst_5 = arith.constant 0.000000e+00 : f32
    %6 = vector.broadcast %cst_5 : f32 to vector<8x256xf32>
    %7 = arith.maximumf %5, %6 : vector<8x256xf32>
    %c0_6 = arith.constant 0 : index
    %c0_7 = arith.constant 0 : index
    %8 = vector.load %arg4[%c0_6, %c0_7] : memref<256x128xf32, #tpu.memory_space<vmem>>, vector<256x128xf32>
    %cst_8 = arith.constant dense<0.000000e+00> : vector<8x128xf32>
    %9 = tpu.matmul %7, %8, %cst_8 {dimension_numbers = #tpu.dot_dimension_numbers<[1], [0], [0], [1], [0, 0, 1, 1], [], []>} : vector<8x256xf32>, vector<256x128xf32>, vector<8x128xf32> -> vector<8x128xf32>
    %c0_9 = arith.constant 0 : index
    %c0_10 = arith.constant 0 : index
    %10 = vector.load %arg5[%c0_9, %c0_10] : memref<1x128xf32, #tpu.memory_space<vmem>>, vector<1x128xf32>
    %11 = vector.broadcast %10 : vector<1x128xf32> to vector<8x128xf32>
    %12 = arith.addf %9, %11 : vector<8x128xf32>
    %cst_11 = arith.constant 0.000000e+00 : f32
    %13 = vector.broadcast %cst_11 : f32 to vector<8x128xf32>
    %14 = arith.maximumf %12, %13 : vector<8x128xf32>
    %c0_12 = arith.constant 0 : index
    %c0_13 = arith.constant 0 : index
    %15 = vector.load %arg6[%c0_12, %c0_13] : memref<128x768xf32, #tpu.memory_space<vmem>>, vector<128x768xf32>
    %cst_14 = arith.constant dense<0.000000e+00> : vector<8x768xf32>
    %16 = tpu.matmul %14, %15, %cst_14 {dimension_numbers = #tpu.dot_dimension_numbers<[1], [0], [0], [1], [0, 0, 1, 1], [], []>} : vector<8x128xf32>, vector<128x768xf32>, vector<8x768xf32> -> vector<8x768xf32>
    %c0_15 = arith.constant 0 : index
    %c0_16 = arith.constant 0 : index
    %17 = vector.load %arg7[%c0_15, %c0_16] : memref<1x768xf32, #tpu.memory_space<vmem>>, vector<1x768xf32>
    %18 = vector.broadcast %17 : vector<1x768xf32> to vector<8x768xf32>
    %19 = arith.addf %16, %18 : vector<8x768xf32>
    %c0_17 = arith.constant 0 : index
    %c0_18 = arith.constant 0 : index
    %20 = vector.load %arg8[%c0_17, %c0_18] : memref<8x768xf32, #tpu.memory_space<vmem>>, vector<8x768xf32>
    tpu.vector_store %arg8[%c0_17, %c0_18], %19 {strides = array<i32>} : memref<8x768xf32, #tpu.memory_space<vmem>>, vector<8x768xf32>,
    return
  }
  func.func @transform_0(%arg0: i32) -> (i32, i32) {
    %c0_i32 = arith.constant 0 : i32
    %c0_i32_0 = arith.constant 0 : i32
    return %arg0, %c0_i32 : i32, i32
  }
  func.func @transform_1(%arg0: i32) -> (i32, i32) {
    %c0_i32 = arith.constant 0 : i32
    %c0_i32_0 = arith.constant 0 : i32
    %c0_i32_1 = arith.constant 0 : i32
    return %c0_i32, %c0_i32_0 : i32, i32
  }
  func.func @transform_2(%arg0: i32) -> (i32, i32) {
    %c0_i32 = arith.constant 0 : i32
    %c0_i32_0 = arith.constant 0 : i32
    %c0_i32_1 = arith.constant 0 : i32
    return %c0_i32, %c0_i32_0 : i32, i32
  }
  func.func @transform_3(%arg0: i32) -> (i32, i32) {
    %c0_i32 = arith.constant 0 : i32
    %c0_i32_0 = arith.constant 0 : i32
    %c0_i32_1 = arith.constant 0 : i32
    return %c0_i32, %c0_i32_0 : i32, i32
  }
  func.func @transform_4(%arg0: i32) -> (i32, i32) {
    %c0_i32 = arith.constant 0 : i32
    %c0_i32_0 = arith.constant 0 : i32
    %c0_i32_1 = arith.constant 0 : i32
    return %c0_i32, %c0_i32_0 : i32, i32
  }
  func.func @transform_5(%arg0: i32) -> (i32, i32) {
    %c0_i32 = arith.constant 0 : i32
    %c0_i32_0 = arith.constant 0 : i32
    %c0_i32_1 = arith.constant 0 : i32
    return %c0_i32, %c0_i32_0 : i32, i32
  }
  func.func @transform_6(%arg0: i32) -> (i32, i32) {
    %c0_i32 = arith.constant 0 : i32
    %c0_i32_0 = arith.constant 0 : i32
    %c0_i32_1 = arith.constant 0 : i32
    return %c0_i32, %c0_i32_0 : i32, i32
  }
  func.func @transform_7(%arg0: i32) -> (i32, i32) {
    %c0_i32 = arith.constant 0 : i32
    %c0_i32_0 = arith.constant 0 : i32
    return %arg0, %c0_i32 : i32, i32
  }
}

</mosaic_0001>

<bundles_post_ra>
// kernel: tpu_custom_call.1
= control target key start
LH: loop header
LB: loop body
LE: loop exit
PB: predicated region body
PF: predicated region fallthrough
CT: control target
= control target key end

     0   :  { %12 = vsyncpa [#allocation3], 0  ;;  %s1139_s0 = inlined_call_operand.hbm [shape: f32[8,128], index: 0, kind: input, shape index: {}]   ;;  %s1140_s1 = inlined_call_operand.hbm [shape: f32[128,256], index: 1, kind: input, shape index: {}]   ;;  %s1141_s2 = inlined_call_operand.vmem [shape: f32[1,256], index: 2, kind: input, shape index: {}]   ;;  %s1142_s3 = inlined_call_operand.hbm [shape: f32[256,128], index: 3, kind: input, shape index: {}]   ;;  %s1143_s4 = inlined_call_operand.vmem [shape: f32[1,128], index: 4, kind: input, shape index: {}]   ;;  %s1144_s5 = inlined_call_operand.hbm [shape: f32[128,768], index: 5, kind: input, shape index: {}]   ;;  %s1145_s6 = inlined_call_operand.vmem [shape: f32[1,768], index: 6, kind: input, shape index: {}]   ;;  %s1146_s7 = inlined_call_operand.hbm [shape: f32[8,768], index: 7, kind: output, shape index: {}]  }
   0x1   :  { %13 = vsyncpa [#allocation6], 0 }
   0x2   :  { %14 = vsyncpa [#allocation9], 0 }
   0x3   :  { %15 = vsyncpa [#allocation4], 0  ;;  %s998_s24 = smov [#allocation5]   ;;  %s880_s28 = scalar_lea.hbm %s1140_s1, 4096 }
   0x4   :  { %s31_s25 = sshll.u32 %s998_s24, 4  ;;  %p881_p0 = scmp.ne.s32.totalorder %s1140_s1, %s880_s28  ;;  %s32_s25 = int_to_ptr.vmem [resolvable:$true] %s31_s25 }
   0x5   :  { %p884_p1 = scmp.lt.u32.totalorder %s880_s28, %s1140_s1 }
   0x7   :  { %p886_p2 = pnand %p884_p1, %p881_p0 }
   0x9   :  { %889 = shalt.err (!%p886_p2)
}
   0xa   :  { %s890_s10 = scalar_lea.vmem %s32_s25, 4096  ;;  %p895_p4 = scmp.lt.s32.totalorder %s32_s25, %s32_s25 }
   0xb   :  { %p891_p3 = scmp.ne.s32.totalorder %s32_s25, %s890_s10  ;;  %p896_p5 = scmp.lt.s32.totalorder %s890_s10, %s890_s10 }
   0xd   :  { %p897_p6 = por %p896_p5, %p895_p4 }
   0xf   :  { %p898_p7 = pnand %p897_p6, %p891_p3 }
  0x11   :  { %901 = shalt.err (!%p898_p7)
}
  0x12   :  { %s999_s11 = smov 256   ;;  %s1000_s12 = smov 16  }
  0x13   :  { %37 = dma.hbm_to_vmem [thread:$0]  %s1140_s1, 4096, %s32_s25, [#allocation6], %s999_s11, %s999_s11, %s1000_s12  }
  0x14   :  { %s1001_s15 = smov [#allocation2]   ;;  %s1002_s17 = smov [#allocation7]  }
  0x15   :  { %s22_s16 = sshll.u32 %s1001_s15, 4  ;;  %s45_s18 = sshll.u32 %s1002_s17, 4  ;;  %s23_s16 = int_to_ptr.vmem [resolvable:$true] %s22_s16  ;;  %s46_s18 = int_to_ptr.vmem [resolvable:$true] %s45_s18 }
  0x16   :  { %s902_s21 = scalar_lea.hbm %s1139_s0, 128 }
  0x17   :  { %p903_p8 = scmp.ne.s32.totalorder %s1139_s0, %s902_s21  ;;  %p906_p9 = scmp.lt.u32.totalorder %s902_s21, %s1139_s0 }
  0x19   :  { %p908_p10 = pnand %p906_p9, %p903_p8 }
  0x1b   :  { %911 = shalt.err (!%p908_p10)
}
  0x1c   :  { %s912_s1 = scalar_lea.vmem %s23_s16, 128  ;;  %p917_p12 = scmp.lt.s32.totalorder %s23_s16, %s23_s16 }
  0x1d   :  { %p913_p11 = scmp.ne.s32.totalorder %s23_s16, %s912_s1  ;;  %p918_p13 = scmp.lt.s32.totalorder %s912_s1, %s912_s1 }
  0x1f   :  { %p919_p0 = por %p918_p13, %p917_p12 }
  0x21   :  { %p920_p1 = pnand %p919_p0, %p913_p11 }
  0x23   :  { %923 = shalt.err (!%p920_p1)
}
  0x24   :  { %25 = dma.hbm_to_vmem [thread:$0]  %s1139_s0, 128, %s23_s16, [#allocation3]  }
  0x25   :  { %s924_s30 = scalar_lea.hbm %s1142_s3, 4096 }
  0x26   :  { %p925_p2 = scmp.ne.s32.totalorder %s1142_s3, %s924_s30  ;;  %p928_p3 = scmp.lt.u32.totalorder %s924_s30, %s1142_s3 }
  0x28   :  { %p930_p4 = pnand %p928_p3, %p925_p2 }
  0x2a   :  { %933 = shalt.err (!%p930_p4)
}
  0x2b   :  { %s934_s12 = scalar_lea.vmem %s46_s18, 4096  ;;  %p939_p6 = scmp.lt.s32.totalorder %s46_s18, %s46_s18 }
  0x2c   :  { %p935_p5 = scmp.ne.s32.totalorder %s46_s18, %s934_s12  ;;  %p940_p7 = scmp.lt.s32.totalorder %s934_s12, %s934_s12 }
  0x2e   :  { %p941_p8 = por %p940_p7, %p939_p6 }
  0x30   :  { %p942_p9 = pnand %p941_p8, %p935_p5 }
  0x32   :  { %945 = shalt.err (!%p942_p9)
}
  0x33   :  { %s1003_s0 = smov 128   ;;  %s1004_s13 = smov 8  }
  0x34   :  { %51 = dma.hbm_to_vmem [thread:$0]  %s1142_s3, 4096, %s46_s18, [#allocation6], %s1003_s0, %s1003_s0, %s1004_s13  }
  0x35   :  { %s1005_s16 = smov [#allocation8]   ;;  %s946_s21 = scalar_lea.hbm %s1144_s5, 12288 }
  0x36   :  { %s59_s17 = sshll.u32 %s1005_s16, 4  ;;  %p947_p10 = scmp.ne.s32.totalorder %s1144_s5, %s946_s21  ;;  %s60_s17 = int_to_ptr.vmem [resolvable:$true] %s59_s17 }
  0x37   :  { %p950_p11 = scmp.lt.u32.totalorder %s946_s21, %s1144_s5 }
  0x39   :  { %p952_p12 = pnand %p950_p11, %p947_p10 }
  0x3b   :  { %955 = shalt.err (!%p952_p12)
}
  0x3c   :  { %s956_s1 = scalar_lea.vmem %s60_s17, 12288  ;;  %p961_p0 = scmp.lt.s32.totalorder %s60_s17, %s60_s17 }
  0x3d   :  { %p957_p13 = scmp.ne.s32.totalorder %s60_s17, %s956_s1  ;;  %p962_p1 = scmp.lt.s32.totalorder %s956_s1, %s956_s1 }
  0x3f   :  { %p963_p2 = por %p962_p1, %p961_p0 }
  0x41   :  { %p964_p3 = pnand %p963_p2, %p957_p13 }
  0x43   :  { %967 = shalt.err (!%p964_p3)
}
  0x44   :  { %s1006_s3 = smov 768   ;;  %s1007_s18 = smov 48  }
  0x45   :  { %65 = dma.hbm_to_vmem [thread:$0]  %s1144_s5, 12288, %s60_s17, [#allocation9], %s1006_s3, %s1006_s3, %s1007_s18  }
  0x46   :  { %990 = dma.done.wait [#allocation3], 128  }
  0x47   :  { %991 = vsyncadd [#allocation3], 4294967168 }
  0x48   :  { %992 = dma.done.wait [#allocation6], 8192  }
  0x49   :  { %993 = vsyncadd [#allocation6], 4294959104 }
  0x4a   :  { %994 = dma.done.wait [#allocation9], 12288  }
  0x4b   :  { %995 = vsyncadd [#allocation9], 4294955008  ;;  %v1008_v0 = vmov 0.0   ;;  %v82_v1 = vld [vmem:[#allocation5 + $0x8] sm:$0xff]  ;;  %v84_v2 = vld [vmem:[#allocation5 + $0x18] sm:$0xff] }
  0x4c   :  { %189 = vmatprep.mubr.f32.mxu0 %v1008_v0  ;;  %v81_v3 = vld [vmem:[#allocation5] sm:$0xff]  ;;  %v708_v4 = vpack.c.bf16 %v84_v2, %v82_v1  ;;  %v83_v5 = vld [vmem:[#allocation5 + $0x10] sm:$0xff]  ;;  %v86_v6 = vld [vmem:[#allocation5 + $0x28] sm:$0xff] }
  0x4d   :  { %v88_v7 = vld [vmem:[#allocation5 + $0x38] sm:$0xff]  ;;  %v710_v8 = vpack.c.bf16 %v83_v5, %v81_v3  ;;  %v85_v10 = vld [vmem:[#allocation5 + $0x20] sm:$0xff]  ;;  %v87_v11 = vld [vmem:[#allocation5 + $0x30] sm:$0xff] }
  0x4e   :  { %v712_v9 = vpack.c.bf16 %v88_v7, %v86_v6  ;;  %v90_v12 = vld [vmem:[#allocation5 + $0x48] sm:$0xff]  ;;  %709 = vmatprep.subr.bf16.mxu0 %v708_v4  ;;  %v92_v13 = vld [vmem:[#allocation5 + $0x58] sm:$0xff]  ;;  %v714_v14 = vpack.c.bf16 %v87_v11, %v85_v10  ;;  %v89_v16 = vld [vmem:[#allocation5 + $0x40] sm:$0xff] }
  0x4f   :  { %711 = vmatpush1.bf16.msra.mxu0 %v710_v8  ;;  %v716_v15 = vpack.c.bf16 %v92_v13, %v90_v12  ;;  %v91_v17 = vld [vmem:[#allocation5 + $0x50] sm:$0xff]  ;;  %v94_v18 = vld [vmem:[#allocation5 + $0x68] sm:$0xff]  ;;  %v96_v19 = vld [vmem:[#allocation5 + $0x78] sm:$0xff] }
  0x50   :  { %713 = vmatprep.subr.bf16.mxu0 %v712_v9  ;;  %v718_v20 = vpack.c.bf16 %v91_v17, %v89_v16  ;;  %v720_v21 = vpack.c.bf16 %v96_v19, %v94_v18  ;;  %v93_v22 = vld [vmem:[#allocation5 + $0x60] sm:$0xff]  ;;  %v95_v23 = vld [vmem:[#allocation5 + $0x70] sm:$0xff]  ;;  %v98_v24 = vld [vmem:[#allocation5 + $0x88] sm:$0xff] }
  0x51   :  { %v100_v25 = vld [vmem:[#allocation5 + $0x98] sm:$0xff]  ;;  %v97_v26 = vld [vmem:[#allocation5 + $0x80] sm:$0xff]  ;;  %v99_v27 = vld [vmem:[#allocation5 + $0x90] sm:$0xff]  ;;  %v722_v31 = vpack.c.bf16 %v95_v23, %v93_v22 }
  0x52   :  { %v214_v28 = vld [vmem:[#allocation7 + $0x80] sm:$0xff]  ;;  %v215_v29 = vld [vmem:[#allocation7 + $0x88] sm:$0xff]  ;;  %v216_v34 = vld [vmem:[#allocation7 + $0x90] sm:$0xff]  ;;  %v724_v36 = vpack.c.bf16 %v100_v25, %v98_v24  ;;  %v726_v46 = vpack.c.bf16 %v99_v27, %v97_v26 }
  0x53   :  { %715 = vmatpush1.bf16.msra.mxu0 %v714_v14  ;;  %v198_v30 = vld [vmem:[#allocation7] sm:$0xff]  ;;  %v740_v32 = vpack.c.bf16 %v215_v29, %v214_v28  ;;  %v199_v33 = vld [vmem:[#allocation7 + $0x8] sm:$0xff]  ;;  %v217_v35 = vld [vmem:[#allocation7 + $0x98] sm:$0xff] }
  0x54   :  { %717 = vmatprep.subr.bf16.mxu0 %v716_v15  ;;  %v742_v37 = vpack.c.bf16 %v199_v33, %v198_v30  ;;  %v744_v38 = vpack.c.bf16 %v217_v35, %v216_v34  ;;  %v200_v39 = vld [vmem:[#allocation7 + $0x10] sm:$0xff]  ;;  %v201_v40 = vld [vmem:[#allocation7 + $0x18] sm:$0xff]  ;;  %v218_v41 = vld [vmem:[#allocation7 + $0xa0] sm:$0xff] }
  0x55   :  { %v102_v42 = vld [vmem:[#allocation5 + $0xa8] sm:$0xff]  ;;  %v104_v43 = vld [vmem:[#allocation5 + $0xb8] sm:$0xff]  ;;  %741 = vmatprep.subr.bf16.mxu1 %v740_v32  ;;  %v746_v45 = vpack.c.bf16 %v201_v40, %v200_v39  ;;  %v101_v47 = vld [vmem:[#allocation5 + $0xa0] sm:$0xff] }
  0x56   :  { %v219_v44 = vld [vmem:[#allocation7 + $0xa8] sm:$0xff]  ;;  %743 = vmatpush3.bf16.msra.mxu1 %v742_v37  ;;  %v202_v49 = vld [vmem:[#allocation7 + $0x20] sm:$0xff]  ;;  %v728_v51 = vpack.c.bf16 %v104_v43, %v102_v42  ;;  %v103_v52 = vld [vmem:[#allocation5 + $0xb0] sm:$0xff] }
  0x57   :  { %719 = vmatpush1.bf16.msra.mxu0 %v718_v20  ;;  %745 = vmatprep.subr.bf16.mxu1 %v744_v38  ;;  %v748_v48 = vpack.c.bf16 %v219_v44, %v218_v41  ;;  %v203_v50 = vld [vmem:[#allocation7 + $0x28] sm:$0xff]  ;;  %v220_v53 = vld [vmem:[#allocation7 + $0xb0] sm:$0xff]  ;;  %v221_v54 = vld [vmem:[#allocation7 + $0xb8] sm:$0xff]  ;;  %v730_v58 = vpack.c.bf16 %v103_v52, %v101_v47 }
  0x58   :  { %721 = vmatprep.subr.bf16.mxu0 %v720_v21  ;;  %v106_v55 = vld [vmem:[#allocation5 + $0xc8] sm:$0xff]  ;;  %v108_v56 = vld [vmem:[#allocation5 + $0xd8] sm:$0xff]  ;;  %v750_v57 = vpack.c.bf16 %v203_v50, %v202_v49  ;;  %v105_v59 = vld [vmem:[#allocation5 + $0xc0] sm:$0xff]  ;;  %v752_v60 = vpack.c.bf16 %v221_v54, %v220_v53 }
  0x59   :  { %v204_v61 = vld [vmem:[#allocation7 + $0x30] sm:$0xff]  ;;  %v205_v62 = vld [vmem:[#allocation7 + $0x38] sm:$0xff]  ;;  %v732_v63 = vpack.c.bf16 %v108_v56, %v106_v55  ;;  %v222_v2 = vld [vmem:[#allocation7 + $0xc0] sm:$0xff] }
  0x5a   :  { %747 = vmatpush3.bf16.msra.mxu1 %v746_v45  ;;  %v107_v1 = vld [vmem:[#allocation5 + $0xd0] sm:$0xff]  ;;  %v223_v3 = vld [vmem:[#allocation7 + $0xc8] sm:$0xff]  ;;  %v112_v5 = vld [vmem:[#allocation5 + $0xf8] sm:$0xff]  ;;  %v754_v6 = vpack.c.bf16 %v205_v62, %v204_v61 }
  0x5b   :  { %723 = vmatpush1.bf16.msra.mxu0 %v722_v31  ;;  %749 = vmatprep.subr.bf16.mxu1 %v748_v48  ;;  %v110_v4 = vld [vmem:[#allocation5 + $0xe8] sm:$0xff]  ;;  %v734_v7 = vpack.c.bf16 %v107_v1, %v105_v59  ;;  %v109_v8 = vld [vmem:[#allocation5 + $0xe0] sm:$0xff]  ;;  %v756_v9 = vpack.c.bf16 %v223_v3, %v222_v2  ;;  %v111_v13 = vld [vmem:[#allocation5 + $0xf0] sm:$0xff] }
  0x5c   :  { %725 = vmatprep.subr.bf16.mxu0 %v724_v36  ;;  %v206_v10 = vld [vmem:[#allocation7 + $0x40] sm:$0xff]  ;;  %v207_v11 = vld [vmem:[#allocation7 + $0x48] sm:$0xff]  ;;  %v736_v12 = vpack.c.bf16 %v112_v5, %v110_v4  ;;  %v224_v14 = vld [vmem:[#allocation7 + $0xd0] sm:$0xff]  ;;  %v738_v17 = vpack.c.bf16 %v111_v13, %v109_v8 }
  0x5d   :  { %v225_v15 = vld [vmem:[#allocation7 + $0xd8] sm:$0xff]  ;;  %v758_v16 = vpack.c.bf16 %v207_v11, %v206_v10  ;;  %v208_v19 = vld [vmem:[#allocation7 + $0x50] sm:$0xff]  ;;  %v226_v21 = vld [vmem:[#allocation7 + $0xe0] sm:$0xff] }
  0x5e   :  { %751 = vmatpush3.bf16.msra.mxu1 %v750_v57  ;;  %v760_v18 = vpack.c.bf16 %v225_v15, %v224_v14  ;;  %v209_v20 = vld [vmem:[#allocation7 + $0x58] sm:$0xff]  ;;  %v227_v22 = vld [vmem:[#allocation7 + $0xe8] sm:$0xff]  ;;  %v210_v26 = vld [vmem:[#allocation7 + $0x60] sm:$0xff]  ;;  %v115_v14 = vlaneseq }
  0x5f   :  { %727 = vmatpush1.bf16.msra.mxu0 %v726_v46  ;;  %753 = vmatprep.subr.bf16.mxu1 %v752_v60  ;;  %v762_v23 = vpack.c.bf16 %v209_v20, %v208_v19  ;;  %v80_v24 = vld [vmem:[#allocation2] sm:$0xff]  ;;  %v764_v25 = vpack.c.bf16 %v227_v22, %v226_v21  ;;  %v211_v27 = vld [vmem:[#allocation7 + $0x68] sm:$0xff]  ;;  %v228_v29 = vld [vmem:[#allocation7 + $0xf0] sm:$0xff] }
  0x60   :  { %729 = vmatprep.subr.bf16.mxu0 %v728_v51  ;;  %v766_v28 = vpack.c.bf16 %v211_v27, %v210_v26  ;;  %v229_v30 = vld [vmem:[#allocation7 + $0xf8] sm:$0xff]  ;;  %v212_v32 = vld [vmem:[#allocation7 + $0x70] sm:$0xff]  ;;  %v309_v35 = vld [vmem:[#allocation8 + $0x8] sm:$0xff]  ;;  %v1100_v15 = vshrl.u32 %v115_v14, 7 }
  0x61   :  { %v768_v31 = vpack.c.bf16 %v229_v30, %v228_v29  ;;  %v213_v33 = vld [vmem:[#allocation7 + $0x78] sm:$0xff]  ;;  %v308_v37 = vld [vmem:[#allocation8] sm:$0xff]  ;;  %v314_v39 = vld [vmem:[#allocation8 + $0x30] sm:$0xff] }
  0x62   :  { %755 = vmatpush3.bf16.msra.mxu1 %v754_v6  ;;  %v770_v34 = vpack.c.bf16 %v213_v33, %v212_v32  ;;  %v315_v36 = vld [vmem:[#allocation8 + $0x38] sm:$0xff]  ;;  %v317_v41 = vld [vmem:[#allocation8 + $0x48] sm:$0xff]  ;;  %v774_v42 = vpack.c.bf16 %v314_v39, %v308_v37  ;;  %v320_v46 = vld [vmem:[#allocation8 + $0x60] sm:$0xff] }
  0x63   :  { %731 = vmatpush1.bf16.msra.mxu0 %v730_v58  ;;  %757 = vmatprep.subr.bf16.mxu1 %v756_v9  ;;  %v772_v38 = vpack.c.bf16 %v315_v36, %v309_v35  ;;  %v311_v40 = vld [vmem:[#allocation8 + $0x18] sm:$0xff]  ;;  %v321_v44 = vld [vmem:[#allocation8 + $0x68] sm:$0xff]  ;;  %v326_v47 = vld [vmem:[#allocation8 + $0x90] sm:$0xff] }
  0x64   :  { %733 = vmatprep.subr.bf16.mxu0 %v732_v63  ;;  %v804_v43 = vpack.c.bf16 %v317_v41, %v311_v40  ;;  %v327_v45 = vld [vmem:[#allocation8 + $0x98] sm:$0xff]  ;;  %v778_v49 = vpack.c.bf16 %v326_v47, %v320_v46  ;;  %v333_v50 = vld [vmem:[#allocation8 + $0xc8] sm:$0xff]  ;;  %v332_v53 = vld [vmem:[#allocation8 + $0xc0] sm:$0xff] }
  0x65   :  { %v776_v48 = vpack.c.bf16 %v327_v45, %v321_v44  ;;  %v339_v51 = vld [vmem:[#allocation8 + $0xf8] sm:$0xff]  ;;  %v338_v54 = vld [vmem:[#allocation8 + $0xf0] sm:$0xff]  ;;  %v345_v56 = vld [vmem:[#allocation8 + $0x128] sm:$0xff] }
  0x66   :  { %759 = vmatpush3.bf16.msra.mxu1 %v758_v16  ;;  %v780_v52 = vpack.c.bf16 %v339_v51, %v333_v50  ;;  %v782_v55 = vpack.c.bf16 %v338_v54, %v332_v53  ;;  %v351_v57 = vld [vmem:[#allocation8 + $0x158] sm:$0xff]  ;;  %v344_v58 = vld [vmem:[#allocation8 + $0x120] sm:$0xff]  ;;  %v350_v60 = vld [vmem:[#allocation8 + $0x150] sm:$0xff]  ;;  %v117_v16 = vsub.s32 0, %v1100_v15 }
  0x67   :  { %735 = vmatpush1.bf16.msra.mxu0 %v734_v7  ;;  %761 = vmatprep.subr.bf16.mxu1 %v760_v18  ;;  %v784_v59 = vpack.c.bf16 %v351_v57, %v345_v56  ;;  %v786_v61 = vpack.c.bf16 %v350_v60, %v344_v58  ;;  %v357_v62 = vld [vmem:[#allocation8 + $0x188] sm:$0xff]  ;;  %v363_v63 = vld [vmem:[#allocation8 + $0x1b8] sm:$0xff]  ;;  %v356_v1 = vld [vmem:[#allocation8 + $0x180] sm:$0xff]  ;;  %v121_v18 = vsub.s32 1, %v1100_v15 }
  0x68   :  { %737 = vmatprep.subr.bf16.mxu0 %v736_v12  ;;  %v788_v2 = vpack.c.bf16 %v363_v63, %v357_v62  ;;  %v362_v3 = vld [vmem:[#allocation8 + $0x1b0] sm:$0xff]  ;;  %v369_v5 = vld [vmem:[#allocation8 + $0x1e8] sm:$0xff]  ;;  %v375_v6 = vld [vmem:[#allocation8 + $0x218] sm:$0xff] }
  0x69   :  { %v790_v4 = vpack.c.bf16 %v362_v3, %v356_v1  ;;  %v368_v7 = vld [vmem:[#allocation8 + $0x1e0] sm:$0xff]  ;;  %v792_v8 = vpack.c.bf16 %v375_v6, %v369_v5  ;;  %v374_v9 = vld [vmem:[#allocation8 + $0x210] sm:$0xff]  ;;  %v381_v11 = vld [vmem:[#allocation8 + $0x248] sm:$0xff] }
  0x6a   :  { %763 = vmatpush3.bf16.msra.mxu1 %v762_v23  ;;  %v794_v10 = vpack.c.bf16 %v374_v9, %v368_v7  ;;  %v387_v12 = vld [vmem:[#allocation8 + $0x278] sm:$0xff]  ;;  %v322_v33 = vld [vmem:[#allocation8 + $0x70] sm:$0xff]  ;;  %v341_v36 = vld [vmem:[#allocation8 + $0x108] sm:$0xff] }
  0x6b   :  { %739 = vmatpush1.bf16.msra.mxu0 %v738_v17  ;;  %765 = vmatprep.subr.bf16.mxu1 %v764_v25  ;;  %v796_v13 = vpack.c.bf16 %v387_v12, %v381_v11  ;;  %v113_v17 = vld [vmem:[%s1141_s2] sm:$0x3]  ;;  %v316_v25 = vld [vmem:[#allocation8 + $0x40] sm:$0xff]  ;;  %v334_v39 = vld [vmem:[#allocation8 + $0xd0] sm:$0xff] }
  0x6c   :  { %773 = vmatprep.subr.bf16.mxu0 %v772_v38  ;;  %v118_v19 = vrot.slane %v113_v17, %v117_v16  ;;  %v122_v20 = vrot.slane %v113_v17, %v121_v18  ;;  %v323_v27 = vld [vmem:[#allocation8 + $0x78] sm:$0xff]  ;;  %v340_v40 = vld [vmem:[#allocation8 + $0x100] sm:$0xff]  ;;  %v346_v45 = vld [vmem:[#allocation8 + $0x130] sm:$0xff] }
  0x6d   :  { %v335_v35 = vld [vmem:[#allocation8 + $0xd8] sm:$0xff]  ;;  %v352_v46 = vld [vmem:[#allocation8 + $0x160] sm:$0xff]  ;;  %v358_v51 = vld [vmem:[#allocation8 + $0x190] sm:$0xff] }
  0x6e   :  { %190 = vmatmul.mubr.f32.vlgmr.msra.gmra.mrb[0].mxu0 %v80_v24  ;;  %767 = vmatpush3.bf16.msra.mxu1 %v766_v28  ;;  %v310_v24 = vld [vmem:[#allocation8 + $0x10] sm:$0xff]  ;;  %v329_v28 = vld [vmem:[#allocation8 + $0xa8] sm:$0xff]  ;;  %v812_v38 = vpack.c.bf16 %v341_v36, %v335_v35  ;;  %v347_v41 = vld [vmem:[#allocation8 + $0x138] sm:$0xff] }
  0x6f   :  { %500 = vmatprep.mubr.f32.mxu0 %v1008_v0  ;;  %769 = vmatprep.subr.bf16.mxu1 %v768_v31  ;;  %v806_v30 = vpack.c.bf16 %v316_v25, %v310_v24  ;;  %v808_v32 = vpack.c.bf16 %v329_v28, %v323_v27  ;;  %v359_v47 = vld [vmem:[#allocation8 + $0x198] sm:$0xff]  ;;  %v377_v54 = vld [vmem:[#allocation8 + $0x228] sm:$0xff]  ;;  %v370_v57 = vld [vmem:[#allocation8 + $0x1f0] sm:$0xff] }
  0x70   :  { %775 = vmatpush1.bf16.msra.mxu0 %v774_v42  ;;  %v353_v42 = vld [vmem:[#allocation8 + $0x168] sm:$0xff]  ;;  %v371_v53 = vld [vmem:[#allocation8 + $0x1f8] sm:$0xff]  ;;  %v376_v58 = vld [vmem:[#allocation8 + $0x220] sm:$0xff] }
  0x71   :  { %777 = vmatprep.subr.bf16.mxu0 %v776_v48  ;;  %v816_v44 = vpack.c.bf16 %v353_v42, %v347_v41  ;;  %v365_v48 = vld [vmem:[#allocation8 + $0x1c8] sm:$0xff]  ;;  %v824_v56 = vpack.c.bf16 %v377_v54, %v371_v53  ;;  %v380_v60 = vld [vmem:[#allocation8 + $0x240] sm:$0xff]  ;;  %v383_v62 = vld [vmem:[#allocation8 + $0x258] sm:$0xff] }
  0x72   :  { %771 = vmatpush3.bf16.msra.mxu1 %v770_v34  ;;  %v328_v34 = vld [vmem:[#allocation8 + $0xa0] sm:$0xff]  ;;  %v820_v50 = vpack.c.bf16 %v365_v48, %v359_v47  ;;  %v389_v1 = vld [vmem:[#allocation8 + $0x288] sm:$0xff]  ;;  %v399_v7 = vld [vmem:[#allocation8 + $0x2d8] sm:$0xff] }
  0x73   :  { %805 = vmatprep.subr.bf16.mxu1 %v804_v43  ;;  %v810_v37 = vpack.c.bf16 %v328_v34, %v322_v33  ;;  %v814_v43 = vpack.c.bf16 %v340_v40, %v334_v39  ;;  %v388_v3 = vld [vmem:[#allocation8 + $0x280] sm:$0xff]  ;;  %v393_v6 = vld [vmem:[#allocation8 + $0x2a8] sm:$0xff]  ;;  %v395_v11 = vld [vmem:[#allocation8 + $0x2b8] sm:$0xff] }
  0x74   :  { %779 = vmatpush1.bf16.msra.mxu0 %v778_v49  ;;  %v818_v49 = vpack.c.bf16 %v352_v46, %v346_v45  ;;  %v392_v9 = vld [vmem:[#allocation8 + $0x2a0] sm:$0xff]  ;;  %v394_v14 = vld [vmem:[#allocation8 + $0x2b0] sm:$0xff]  ;;  %v672_v25 = vld [vmem:[%s1143_s4] ss:$0 sm:$0xff] }
  0x75   :  { %781 = vmatprep.subr.bf16.mxu0 %v780_v52  ;;  %v364_v52 = vld [vmem:[#allocation8 + $0x1c0] sm:$0xff]  ;;  %v343_v39 = vld [vmem:[#allocation8 + $0x118] sm:$0xff] }
  0x76   :  { %v400_v17 = vld [vmem:[#allocation8 + $0x2e0] sm:$0xff]  ;;  %v355_v45 = vld [vmem:[#allocation8 + $0x178] sm:$0xff] }
  0x77   :  { %v312_v28 = vld [vmem:[#allocation8 + $0x20] sm:$0xff] }
  0x78   :  { %783 = vmatpush1.bf16.msra.mxu0 %v782_v55  ;;  %v822_v55 = vpack.c.bf16 %v364_v52, %v358_v51  ;;  %v324_v36 = vld [vmem:[#allocation8 + $0x80] sm:$0xff]  ;;  %v367_v51 = vld [vmem:[#allocation8 + $0x1d8] sm:$0xff] }
  0x79   :  { %785 = vmatprep.subr.bf16.mxu0 %v784_v59  ;;  %v826_v59 = vpack.c.bf16 %v376_v58, %v370_v57  ;;  %v336_v42 = vld [vmem:[#allocation8 + $0xe0] sm:$0xff] }
  0x7a   :  { %v348_v48 = vld [vmem:[#allocation8 + $0x140] sm:$0xff] }
  0x7b   :  { %v360_v54 = vld [vmem:[#allocation8 + $0x1a0] sm:$0xff] }
  0x7c   :  { %787 = vmatpush1.bf16.msra.mxu0 %v786_v61  ;;  %v386_v61 = vld [vmem:[#allocation8 + $0x270] sm:$0xff] }
  0x7d   :  { %789 = vmatprep.subr.bf16.mxu0 %v788_v2  ;;  %v798_v63 = vpack.c.bf16 %v386_v61, %v380_v60  ;;  %v382_v2 = vld [vmem:[#allocation8 + $0x250] sm:$0xff]  ;;  %v385_v61 = vld [vmem:[#allocation8 + $0x268] sm:$0xff] }
  0x7e   :  { %v830_v5 = vpack.c.bf16 %v388_v3, %v382_v2  ;;  %v378_v60 = vld [vmem:[#allocation8 + $0x230] sm:$0xff]  ;;  %v384_v2 = vld [vmem:[#allocation8 + $0x260] sm:$0xff] }
  0x7f   :  { %v390_v3 = vld [vmem:[#allocation8 + $0x290] sm:$0xff] }
  0x80   :  { %791 = vmatpush1.bf16.msra.mxu0 %v790_v4  ;;  %v828_v4 = vpack.c.bf16 %v389_v1, %v383_v62  ;;  %v391_v62 = vld [vmem:[#allocation8 + $0x298] sm:$0xff] }
  0x81   :  { %793 = vmatprep.subr.bf16.mxu0 %v792_v8  ;;  %v800_v8 = vpack.c.bf16 %v399_v7, %v393_v6  ;;  %v860_v1 = vpack.c.bf16 %v391_v62, %v385_v61  ;;  %v862_v6 = vpack.c.bf16 %v390_v3, %v384_v2 }
  0x84   :  { %795 = vmatpush1.bf16.msra.mxu0 %v794_v10  ;;  %v398_v10 = vld [vmem:[#allocation8 + $0x2d0] sm:$0xff] }
  0x85   :  { %797 = vmatprep.subr.bf16.mxu0 %v796_v13  ;;  %v802_v12 = vpack.c.bf16 %v398_v10, %v392_v9  ;;  %v401_v13 = vld [vmem:[#allocation8 + $0x2e8] sm:$0xff]  ;;  %v402_v9 = vld [vmem:[#allocation8 + $0x2f0] sm:$0xff] }
  0x88   :  { %799 = vmatpush1.bf16.msra.mxu0 %v798_v63 }
  0x89   :  { %801 = vmatprep.subr.bf16.mxu0 %v800_v8  ;;  %v396_v8 = vld [vmem:[#allocation8 + $0x2c0] sm:$0xff] }
  0x8a   :  { %v866_v10 = vpack.c.bf16 %v402_v9, %v396_v8 }
  0x8c   :  { %803 = vmatpush1.bf16.msra.mxu0 %v802_v12  ;;  %v404_v12 = vld [vmem:[%s1145_s6] sm:$0x3f]  ;;  %s1009_s6 = smov [#allocation10]  }
  0x8d   :  { %s661_s8 = sshll.u32 %s1009_s6, 4  ;;  %s662_s8 = int_to_ptr.vmem [resolvable:$true] %s661_s8 }
  0x8e   :  { %s968_s9 = scalar_lea.vmem %s662_s8, 768  ;;  %p973_p5 = scmp.lt.s32.totalorder %s662_s8, %s662_s8 }
  0x8f   :  { %p969_p4 = scmp.ne.s32.totalorder %s662_s8, %s968_s9  ;;  %p974_p6 = scmp.lt.s32.totalorder %s968_s9, %s968_s9 }
  0x91   :  { %p975_p7 = por %p974_p6, %p973_p5 }
  0x93   :  { %p976_p8 = pnand %p975_p7, %p969_p4 }
 0x141   :  { %v191_v21 = vpop.f32.mrb[0].mxu0 }
 0x142   :  { %v192_v22 = vadd.f32 %v191_v21, %v118_v19  ;;  %v193_v23 = vpop.f32.mrb[1].mxu0  ;;  %v832_v19 = vpack.c.bf16 %v401_v13, %v395_v11  ;;  %v313_v21 = vld [vmem:[#allocation8 + $0x28] sm:$0xff]  ;;  %v416_v11 = vsub.s32 2, %v1100_v15  ;;  %v420_v13 = vsub.s32 3, %v1100_v15 }
 0x143   :  { %v194_v26 = vadd.f32 %v193_v23, %v122_v20  ;;  %v834_v20 = vpack.c.bf16 %v400_v17, %v394_v14  ;;  %v409_v14 = vrot.slane %v404_v12, %v117_v16  ;;  %v428_v16 = vsub.s32 5, %v1100_v15 }
 0x144   :  { %v196_v31 = vmax.f32 %v192_v22, 0.0  ;;  %v319_v22 = vld [vmem:[#allocation8 + $0x58] sm:$0xff]  ;;  %v417_v17 = vrot.slane %v404_v12, %v416_v11 }
 0x145   :  { %v197_v29 = vmax.f32 %v194_v26, 0.0  ;;  %v836_v23 = vpack.c.bf16 %v319_v22, %v313_v21 }
 0x147   :  { %301 = vmatprep.mubr.f32.mxu1 %v197_v29  ;;  %837 = vmatprep.subr.bf16.mxu0 %v836_v23  ;;  %v318_v29 = vld [vmem:[#allocation8 + $0x50] sm:$0xff] }
 0x148   :  { %302 = vmatmul.mubr.f32.vlgmr.msra.gmra.mrb[0].mxu1 %v196_v31  ;;  %v331_v31 = vld [vmem:[#allocation8 + $0xb8] sm:$0xff]  ;;  %v838_v33 = vpack.c.bf16 %v318_v29, %v312_v28  ;;  %v424_v29 = vsub.s32 4, %v1100_v15 }
 0x149   :  { %807 = vmatpush1.bf16.msra.mxu1 %v806_v30  ;;  %571 = vmatprep.mubr.f32.mxu1 %v1008_v0  ;;  %v325_v30 = vld [vmem:[#allocation8 + $0x88] sm:$0xff] }
 0x14a   :  { %809 = vmatprep.subr.bf16.mxu1 %v808_v32  ;;  %v840_v35 = vpack.c.bf16 %v331_v31, %v325_v30  ;;  %v425_v30 = vrot.slane %v404_v12, %v424_v29  ;;  %v429_v31 = vrot.slane %v404_v12, %v428_v16 }
 0x14d   :  { %811 = vmatpush1.bf16.msra.mxu1 %v810_v37  ;;  %v330_v37 = vld [vmem:[#allocation8 + $0xb0] sm:$0xff] }
 0x14e   :  { %813 = vmatprep.subr.bf16.mxu1 %v812_v38  ;;  %v337_v38 = vld [vmem:[#allocation8 + $0xe8] sm:$0xff]  ;;  %v842_v40 = vpack.c.bf16 %v330_v37, %v324_v36 }
 0x14f   :  { %v844_v41 = vpack.c.bf16 %v343_v39, %v337_v38 }
 0x151   :  { %815 = vmatpush1.bf16.msra.mxu1 %v814_v43  ;;  %v342_v43 = vld [vmem:[#allocation8 + $0x110] sm:$0xff] }
 0x152   :  { %817 = vmatprep.subr.bf16.mxu1 %v816_v44  ;;  %v349_v44 = vld [vmem:[#allocation8 + $0x148] sm:$0xff]  ;;  %v846_v46 = vpack.c.bf16 %v342_v43, %v336_v42 }
 0x153   :  { %v848_v47 = vpack.c.bf16 %v355_v45, %v349_v44 }
 0x155   :  { %819 = vmatpush1.bf16.msra.mxu1 %v818_v49  ;;  %v354_v49 = vld [vmem:[#allocation8 + $0x170] sm:$0xff] }
 0x156   :  { %821 = vmatprep.subr.bf16.mxu1 %v820_v50  ;;  %v361_v50 = vld [vmem:[#allocation8 + $0x1a8] sm:$0xff]  ;;  %v850_v52 = vpack.c.bf16 %v354_v49, %v348_v48 }
 0x157   :  { %v852_v53 = vpack.c.bf16 %v367_v51, %v361_v50 }
 0x159   :  { %823 = vmatpush1.bf16.msra.mxu1 %v822_v55  ;;  %v373_v55 = vld [vmem:[#allocation8 + $0x208] sm:$0xff] }
 0x15a   :  { %825 = vmatprep.subr.bf16.mxu1 %v824_v56  ;;  %v379_v56 = vld [vmem:[#allocation8 + $0x238] sm:$0xff] }
 0x15b   :  { %v856_v58 = vpack.c.bf16 %v379_v56, %v373_v55 }
 0x15d   :  { %827 = vmatpush1.bf16.msra.mxu1 %v826_v59  ;;  %v372_v59 = vld [vmem:[#allocation8 + $0x200] sm:$0xff] }
 0x15e   :  { %829 = vmatprep.subr.bf16.mxu1 %v828_v4  ;;  %v858_v63 = vpack.c.bf16 %v378_v60, %v372_v59  ;;  %v397_v4 = vld [vmem:[#allocation8 + $0x2c8] sm:$0xff] }
 0x161   :  { %831 = vmatpush1.bf16.msra.mxu1 %v830_v5  ;;  %v403_v5 = vld [vmem:[#allocation8 + $0x2f8] sm:$0xff] }
 0x162   :  { %833 = vmatprep.subr.bf16.mxu1 %v832_v19  ;;  %v864_v7 = vpack.c.bf16 %v403_v5, %v397_v4  ;;  %v413_v19 = vrot.slane %v404_v12, %v121_v18 }
 0x165   :  { %835 = vmatpush1.bf16.msra.mxu1 %v834_v20  ;;  %v421_v20 = vrot.slane %v404_v12, %v420_v13 }
 0x21b   :  { %v705_v24 = vpop.f32.mrb[0].mxu1 }
 0x21c   :  { %v706_v26 = vpop.f32.mrb[1].mxu1 }
 0x21d   :  { %v707_v27 = vadd.f32 %v706_v26, %v705_v24 }
 0x21f   :  { %v304_v32 = vadd.f32 %v707_v27, %v672_v25 }
 0x221   :  { %v307_v34 = vmax.f32 %v304_v32, 0.0 }
 0x223   :  { %501 = vmatmul.mubr.f32.vlgmr.msra.gmra.mrb[2].mxu0 %v307_v34  ;;  %572 = vmatmul.mubr.f32.vlgmr.msra.gmra.mrb[2].mxu1 %v307_v34 }
 0x224   :  { %839 = vmatpush1.bf16.msra.mxu0 %v838_v33  ;;  %642 = vmatprep.mubr.f32.mxu0 %v1008_v0  ;;  %v366_v0 = vld [vmem:[#allocation8 + $0x1d0] sm:$0xff] }
 0x225   :  { %841 = vmatprep.subr.bf16.mxu0 %v840_v35  ;;  %v854_v57 = vpack.c.bf16 %v366_v0, %v360_v54 }
 0x228   :  { %843 = vmatpush1.bf16.msra.mxu0 %v842_v40 }
 0x229   :  { %845 = vmatprep.subr.bf16.mxu0 %v844_v41 }
 0x22c   :  { %847 = vmatpush1.bf16.msra.mxu0 %v846_v46 }
 0x22d   :  { %849 = vmatprep.subr.bf16.mxu0 %v848_v47 }
 0x230   :  { %851 = vmatpush1.bf16.msra.mxu0 %v850_v52 }
 0x231   :  { %853 = vmatprep.subr.bf16.mxu0 %v852_v53 }
 0x234   :  { %855 = vmatpush1.bf16.msra.mxu0 %v854_v57 }
 0x235   :  { %857 = vmatprep.subr.bf16.mxu0 %v856_v58 }
 0x238   :  { %859 = vmatpush1.bf16.msra.mxu0 %v858_v63 }
 0x239   :  { %861 = vmatprep.subr.bf16.mxu0 %v860_v1 }
 0x23c   :  { %863 = vmatpush1.bf16.msra.mxu0 %v862_v6 }
 0x23d   :  { %865 = vmatprep.subr.bf16.mxu0 %v864_v7 }
 0x240   :  { %867 = vmatpush1.bf16.msra.mxu0 %v866_v10 }
 0x243   :  { %643 = vmatmul.mubr.f32.vlgmr.msra.gmra.mrb[4].mxu0 %v307_v34 }
 0x2f6   :  { %v502_v21 = vpop.f32.mrb[2].mxu0  ;;  %v573_v22 = vpop.f32.mrb[2].mxu1 }
 0x2f7   :  { %v503_v23 = vadd.f32 %v502_v21, %v409_v14  ;;  %v574_v24 = vadd.f32 %v573_v22, %v417_v17  ;;  %v504_v25 = vpop.f32.mrb[3].mxu0  ;;  %v575_v26 = vpop.f32.mrb[3].mxu1 }
 0x2f8   :  { %v505_v27 = vadd.f32 %v504_v25, %v413_v19  ;;  %v576_v28 = vadd.f32 %v575_v26, %v421_v20 }
 0x2f9   :  { %649 = vst [vmem:[#allocation10] sm:$0xff] %v503_v23  ;;  %651 = vst [vmem:[#allocation10 + $0x10] sm:$0xff] %v574_v24 }
 0x2fa   :  { %650 = vst [vmem:[#allocation10 + $0x8] sm:$0xff] %v505_v27  ;;  %652 = vst [vmem:[#allocation10 + $0x18] sm:$0xff] %v576_v28 }
 0x316   :  { %v644_v18 = vpop.f32.mrb[4].mxu0 }
 0x317   :  { %v645_v32 = vadd.f32 %v644_v18, %v425_v30  ;;  %v646_v33 = vpop.f32.mrb[5].mxu0 }
 0x318   :  { %v647_v34 = vadd.f32 %v646_v33, %v429_v31 }
 0x319   :  { %653 = vst [vmem:[#allocation10 + $0x20] sm:$0xff] %v645_v32 }
 0x31a   :  { %654 = vst [vmem:[#allocation10 + $0x28] sm:$0xff] %v647_v34 }
 0x31b   :  { %979 = shalt.err (!%p976_p8)
}
 0x31c   :  { %s980_s12 = scalar_lea.hbm %s1146_s7, 768 }
 0x31d   :  { %p981_p9 = scmp.ne.s32.totalorder %s1146_s7, %s980_s12  ;;  %p984_p10 = scmp.lt.u32.totalorder %s980_s12, %s1146_s7 }
 0x31f   :  { %p986_p11 = pnand %p984_p10, %p981_p9 }
 0x321   :  { %989 = shalt.err (!%p986_p11)
}
 0x322   :  { %664 = dma.vmem_to_hbm [thread:$0]  %s662_s8, 768, %s1146_s7, [#allocation4]  }
 0x323   :  { %996 = dma.done.wait [#allocation4], 768  }
 0x324   :  { %997 = vsyncadd [#allocation4], 4294966528 }
 0x325   :  { %668 = vsyncpa [#allocation3], 1 }
 0x326   :  { %669 = vsyncpa [#allocation6], 1 }
 0x327   :  { %670 = vsyncpa [#allocation9], 1 }
 0x328   :  { %671 = vsyncpa [#allocation4], 1 }

</bundles_post_ra>
